<compile_context>
chip_gen: v7x
topology: tpu7x:2x2x1
jax: 0.10.0
libtpu: 0.0.40
codegen_flags: <defaults>
</compile_context>

<pallas_src>
import functools
import math

import jax
import jax.numpy as jnp
from jax import lax
from jax.experimental import pallas as pl
from jax.experimental.pallas import tpu as pltpu


_VMEM_BUDGET_BYTES = 20 * 1024 * 1024   # target for the double-buffered working set
_VMEM_LIMIT_BYTES = 32 * 1024 * 1024    # safe on v5e/v6e (128 MiB) and v7x (64 MiB)


def _matcher_kernel(feat_ref, pk_ref, pkt_ref, out_ref, energy_ref, *, pool):
    # feat_ref:   (1, C, T)    channel-major feature tile (spatial T in lanes)
    # pk_ref:     (1, NP, C)   per-batch patches @ B^T  (precomputed in wrapper)
    # pkt_ref:    (1, C, NP)   its transpose (so the energy matmul needs no
    #                          in-kernel transpose of the big feat tile)
    # out_ref:    (1, C+1, T)  fused output: feature pass-through + corr row
    # energy_ref: (1, T, NP)   energy already in the module's (hw, npatch) layout
    c = feat_ref.shape[1]
    feat = feat_ref[0]                                                    # (C, T)
    pk = pk_ref[0]                                                        # (NP, C)
    pkt = pkt_ref[0]                                                      # (C, NP)

    # energy[q, n] = sum_c feat[c, q] * pk[n, c].  Contract dim 0 of both
    # operands ("dW"-style transposed matmul) to get (T, NP) directly, which
    # DMAs straight into the contract layout (bs, hw, npatch).
    energy_qt = lax.dot_general(feat, pkt, (((0,), (0,)), ((), ())),
                                preferred_element_type=jnp.float32)       # (T, NP)
    energy_ref[0] = energy_qt.astype(energy_ref.dtype)

    # Lane-dense corr row: reduce the (NP, T) orientation over patches
    # (sublane reduce -> (1, T)).  The extra tiny matmul is free (MXU slack).
    energy_nt = jnp.dot(pk, feat, preferred_element_type=jnp.float32)     # (NP, T)
    if pool == 'mean':
        corr = jnp.mean(energy_nt, axis=0, keepdims=True)                 # (1, T)
    else:  # 'max'
        corr = jnp.max(energy_nt, axis=0, keepdims=True)

    # Fused concat: features pass straight through VMEM, corr is the extra row.
    out_ref[0, :c, :] = feat.astype(out_ref.dtype)
    out_ref[0, c:c + 1, :] = corr.astype(out_ref.dtype)


def _pick_hw_tile(hw, c, npatch, in_itemsize, out_itemsize):
    """Largest lane-dense spatial tile whose double-buffered footprint fits."""
    def pad(n, m):
        return -(-n // m) * m

    def footprint(t):
        lanes = pad(t, 128)
        feat_b = pad(c, 8) * lanes * in_itemsize
        out_b = pad(c + 1, 8) * lanes * out_itemsize
        energy_b = pad(t, 8) * pad(npatch, 128) * 4
        pk_b = pad(npatch, 8) * pad(c, 128) * in_itemsize
        pkt_b = pad(c, 8) * pad(npatch, 128) * in_itemsize
        return 2 * (feat_b + out_b + energy_b + pk_b + pkt_b)  # double-buffered

    candidates = [t for t in (2048, 1024, 512, 256, 128) if hw % t == 0]
    if hw <= 2048 or not candidates:
        # Tiny problem (or hw not 128-divisible): a single full-hw tile per
        # batch avoids needless grid-step overhead (~0.35 us/step).
        candidates = [hw] + candidates
    for t in sorted(set(candidates), reverse=True):
        if footprint(t) <= _VMEM_BUDGET_BYTES:
            return t
    return min(candidates)


def bilinear_similarity_matcher(features, patches, wq, wk, *,
                                pool='mean', compute_dtype=None):
    """features: (bs, c, h, w) NCHW; patches: (npatch, bs, c); wq/wk: (proj, c)."""
    assert pool in ('mean', 'max')
    bs, c, h, w = features.shape
    npatch = patches.shape[0]
    hw = h * w

    # Channel-major end-to-end: free reshape, no HBM transpose of the feature map.
    feat_cm = features.reshape(bs, c, hw)                     # (bs, c, hw)
    patches_bf = patches.transpose(1, 0, 2)                   # (bs, npatch, c)  tiny

    # Fold the two projections and the patch-side matmul once in the wrapper:
    #   B = Wq^T @ Wk ;  pk[b] = patches[b] @ B^T ; energy[b] = feat[b]^T @ pk[b]^T.
    bmat = wq.T @ wk                                          # (c, c)
    pk = jnp.einsum('bnd,cd->bnc', patches_bf, bmat)          # (bs, npatch, c)
    pkt = pk.transpose(0, 2, 1)                               # (bs, c, npatch)

    if compute_dtype is not None:   # e.g. jnp.bfloat16 (halves feat HBM traffic on
        feat_cm = feat_cm.astype(compute_dtype)               # v6e/v7x; pass-through
        pk = pk.astype(compute_dtype)                         # channels get rounded)
        pkt = pkt.astype(compute_dtype)

    out_dtype = features.dtype
    t_hw = _pick_hw_tile(hw, c, npatch,
                         feat_cm.dtype.itemsize, jnp.dtype(out_dtype).itemsize)
    grid = (bs, hw // t_hw)

    kernel = functools.partial(_matcher_kernel, pool=pool)

    out_cm, energy = pl.pallas_call(
        kernel,
        out_shape=(
            jax.ShapeDtypeStruct((bs, c + 1, hw), out_dtype),
            jax.ShapeDtypeStruct((bs, hw, npatch), jnp.float32),
        ),
        grid_spec=pltpu.PrefetchScalarGridSpec(
            num_scalar_prefetch=0,
            grid=grid,
            in_specs=[
                pl.BlockSpec((1, c, t_hw), lambda b, t: (b, 0, t)),
                pl.BlockSpec((1, npatch, c), lambda b, t: (b, 0, 0)),
                pl.BlockSpec((1, c, npatch), lambda b, t: (b, 0, 0)),
            ],
            out_specs=[
                pl.BlockSpec((1, c + 1, t_hw), lambda b, t: (b, 0, t)),
                pl.BlockSpec((1, t_hw, npatch), lambda b, t: (b, t, 0)),
            ],
        ),
        compiler_params=pltpu.CompilerParams(
            dimension_semantics=("parallel", "parallel"),
            vmem_limit_bytes=_VMEM_LIMIT_BYTES),
    )(feat_cm, pk, pkt)

    # Free reshape: channel-major (bs, c+1, hw) -> NCHW (bs, c+1, h, w).
    out = out_cm.reshape(bs, c + 1, h, w)
    return out, energy


def xavier_uniform(key, shape):
    fan_out, fan_in = shape
    bound = math.sqrt(6.0 / (fan_in + fan_out))
    return jax.random.uniform(key, shape, jnp.float32, -bound, bound)


def _reference(features, patches, wq, wk, pool):
    bs, c, h, w = features.shape
    feat_flat = features.reshape(bs, c, h * w).transpose(0, 2, 1)
    q = feat_flat @ wq.T
    k = patches @ wk.T                                   # (npatch, bs, proj)
    energy = jnp.einsum('bqp,nbp->bqn', q, k)
    if pool == 'mean':
        corr = energy.mean(-1, keepdims=True)
    else:
        corr = energy.max(-1, keepdims=True)
    out = jnp.concatenate([feat_flat, corr], -1).transpose(0, 2, 1)
    return out.reshape(bs, c + 1, h, w), energy


if __name__ == "__main__":
    # Small shapes: bs=2, hidden_dim=c=32, h=w=16, npatch=8, proj_dim=32.
    bs, hidden_dim, h, w = 2, 32, 16, 16
    npatch, proj_dim = 8, 32

    key = jax.random.PRNGKey(0)
    k_feat, k_patch, k_wq, k_wk = jax.random.split(key, 4)

    features = jax.random.normal(k_feat, (bs, hidden_dim, h, w), jnp.float32)
    patches = jax.random.normal(k_patch, (npatch, bs, hidden_dim), jnp.float32)

    # nn.Linear weights are (out_features, in_features), xavier_uniform, no bias.
    wq = xavier_uniform(k_wq, (proj_dim, hidden_dim))
    wk = xavier_uniform(k_wk, (proj_dim, hidden_dim))

    out, energy = bilinear_similarity_matcher(features, patches, wq, wk, pool='mean')
    jax.block_until_ready((out, energy))

    out_ref, energy_ref = _reference(features, patches, wq, wk, 'mean')
    assert out.shape == (bs, hidden_dim + 1, h, w)
    assert energy.shape == (bs, h * w, npatch)
    # B-folding reassociates the matmuls -> tiny fp difference; 1e-3 is tight
    # enough to catch real bugs.
    assert jnp.allclose(energy, energy_ref, atol=1e-3, rtol=1e-3)
    assert jnp.allclose(out, out_ref, atol=1e-3, rtol=1e-3)

    # Also exercise the 'max' pooling path.
    out_m, energy_m = bilinear_similarity_matcher(features, patches, wq, wk, pool='max')
    jax.block_until_ready((out_m, energy_m))
    out_mr, energy_mr = _reference(features, patches, wq, wk, 'max')
    assert jnp.allclose(energy_m, energy_mr, atol=1e-3, rtol=1e-3)
    assert jnp.allclose(out_m, out_mr, atol=1e-3, rtol=1e-3)

    print("KERNEL_OK")
</pallas_src>

<mosaic_0001>
module attributes {stable_mosaic.version = 11 : i64} {
  func.func @_matcher_kernel(%arg0: i32, %arg1: i32, %arg2: memref<1x32x256xf32, #tpu.memory_space<vmem>>, %arg3: memref<1x8x32xf32, #tpu.memory_space<vmem>>, %arg4: memref<1x32x8xf32, #tpu.memory_space<vmem>>, %arg5: memref<1x33x256xf32, #tpu.memory_space<vmem>>, %arg6: memref<1x256x8xf32, #tpu.memory_space<vmem>>) attributes {dimension_semantics = [#tpu.dimension_semantics<parallel>, #tpu.dimension_semantics<parallel>], iteration_bounds = array<i64: 2, 1>, scalar_prefetch = 0 : i64, scratch_operands = 0 : i64, tpu.core_type = #tpu.core_type<tc>, window_params = [{transform_indices = @transform_0, window_bounds = array<i64: 1, 32, 256>}, {transform_indices = @transform_1, window_bounds = array<i64: 1, 8, 32>}, {transform_indices = @transform_2, window_bounds = array<i64: 1, 32, 8>}, {transform_indices = @transform_3, window_bounds = array<i64: 1, 33, 256>}, {transform_indices = @transform_4, window_bounds = array<i64: 1, 256, 8>}]} {
    %c0 = arith.constant 0 : index
    %c0_0 = arith.constant 0 : index
    %c0_1 = arith.constant 0 : index
    %0 = vector.load %arg2[%c0, %c0_0, %c0_1] : memref<1x32x256xf32, #tpu.memory_space<vmem>>, vector<1x32x256xf32>
    %1 = vector.shape_cast %0 : vector<1x32x256xf32> to vector<32x256xf32>
    %c0_2 = arith.constant 0 : index
    %c0_3 = arith.constant 0 : index
    %c0_4 = arith.constant 0 : index
    %2 = vector.load %arg3[%c0_2, %c0_3, %c0_4] : memref<1x8x32xf32, #tpu.memory_space<vmem>>, vector<1x8x32xf32>
    %3 = vector.shape_cast %2 : vector<1x8x32xf32> to vector<8x32xf32>
    %c0_5 = arith.constant 0 : index
    %c0_6 = arith.constant 0 : index
    %c0_7 = arith.constant 0 : index
    %4 = vector.load %arg4[%c0_5, %c0_6, %c0_7] : memref<1x32x8xf32, #tpu.memory_space<vmem>>, vector<1x32x8xf32>
    %5 = vector.shape_cast %4 : vector<1x32x8xf32> to vector<32x8xf32>
    %cst = arith.constant dense<0.000000e+00> : vector<256x8xf32>
    %6 = tpu.matmul %1, %5, %cst {dimension_numbers = #tpu.dot_dimension_numbers<[0], [0], [1], [1], [0, 1, 1, 1], [], []>} : vector<32x256xf32>, vector<32x8xf32>, vector<256x8xf32> -> vector<256x8xf32>
    %c0_8 = arith.constant 0 : index
    %c0_9 = arith.constant 0 : index
    %c0_10 = arith.constant 0 : index
    %7 = vector.load %arg6[%c0_8, %c0_9, %c0_10] : memref<1x256x8xf32, #tpu.memory_space<vmem>>, vector<1x256x8xf32>
    %8 = vector.shape_cast %7 : vector<1x256x8xf32> to vector<256x8xf32>
    %9 = vector.shape_cast %6 : vector<256x8xf32> to vector<1x256x8xf32>
    tpu.vector_store %arg6[%c0_8, %c0_9, %c0_10], %9 {strides = array<i32>} : memref<1x256x8xf32, #tpu.memory_space<vmem>>, vector<1x256x8xf32>,
    %cst_11 = arith.constant dense<0.000000e+00> : vector<8x256xf32>
    %10 = tpu.matmul %3, %1, %cst_11 {dimension_numbers = #tpu.dot_dimension_numbers<[1], [0], [0], [1], [0, 0, 1, 1], [], []>} : vector<8x32xf32>, vector<32x256xf32>, vector<8x256xf32> -> vector<8x256xf32>
    %cst_12 = arith.constant dense<0.000000e+00> : vector<256xf32>
    %11 = vector.multi_reduction <add>, %10, %cst_12 [0] : vector<8x256xf32> to vector<256xf32>
    %12 = vector.shape_cast %11 : vector<256xf32> to vector<1x256xf32>
    %cst_13 = arith.constant 8.000000e+00 : f32
    %13 = vector.broadcast %cst_13 : f32 to vector<1x256xf32>
    %14 = arith.divf %12, %13 : vector<1x256xf32>
    %c0_14 = arith.constant 0 : index
    %c0_15 = arith.constant 0 : index
    %c0_16 = arith.constant 0 : index
    %15 = vector.load %arg5[%c0_14, %c0_15, %c0_16] : memref<1x33x256xf32, #tpu.memory_space<vmem>>, vector<1x32x256xf32>
    %16 = vector.shape_cast %15 : vector<1x32x256xf32> to vector<32x256xf32>
    %17 = vector.shape_cast %1 : vector<32x256xf32> to vector<1x32x256xf32>
    tpu.vector_store %arg5[%c0_14, %c0_15, %c0_16], %17 {strides = array<i32>} : memref<1x33x256xf32, #tpu.memory_space<vmem>>, vector<1x32x256xf32>,
    %c0_17 = arith.constant 0 : index
    %c32 = arith.constant 32 : index
    %c0_18 = arith.constant 0 : index
    %18 = vector.load %arg5[%c0_17, %c32, %c0_18] : memref<1x33x256xf32, #tpu.memory_space<vmem>>, vector<1x1x256xf32>
    %19 = vector.shape_cast %18 : vector<1x1x256xf32> to vector<1x256xf32>
    %20 = vector.shape_cast %14 : vector<1x256xf32> to vector<1x1x256xf32>
    tpu.vector_store %arg5[%c0_17, %c32, %c0_18], %20 {strides = array<i32>} : memref<1x33x256xf32, #tpu.memory_space<vmem>>, vector<1x1x256xf32>,
    return
  }
  func.func @transform_0(%arg0: i32, %arg1: i32) -> (i32, i32, i32) {
    %c0_i32 = arith.constant 0 : i32
    %c0_i32_0 = arith.constant 0 : i32
    return %arg0, %c0_i32, %arg1 : i32, i32, i32
  }
  func.func @transform_1(%arg0: i32, %arg1: i32) -> (i32, i32, i32) {
    %c0_i32 = arith.constant 0 : i32
    %c0_i32_0 = arith.constant 0 : i32
    %c0_i32_1 = arith.constant 0 : i32
    return %arg0, %c0_i32, %c0_i32_0 : i32, i32, i32
  }
  func.func @transform_2(%arg0: i32, %arg1: i32) -> (i32, i32, i32) {
    %c0_i32 = arith.constant 0 : i32
    %c0_i32_0 = arith.constant 0 : i32
    %c0_i32_1 = arith.constant 0 : i32
    return %arg0, %c0_i32, %c0_i32_0 : i32, i32, i32
  }
  func.func @transform_3(%arg0: i32, %arg1: i32) -> (i32, i32, i32) {
    %c0_i32 = arith.constant 0 : i32
    %c0_i32_0 = arith.constant 0 : i32
    return %arg0, %c0_i32, %arg1 : i32, i32, i32
  }
  func.func @transform_4(%arg0: i32, %arg1: i32) -> (i32, i32, i32) {
    %c0_i32 = arith.constant 0 : i32
    %c0_i32_0 = arith.constant 0 : i32
    return %arg0, %arg1, %c0_i32 : i32, i32, i32
  }
}

</mosaic_0001>

<bundles_post_ra>
// kernel: tpu_custom_call.1
= control target key start
LH: loop header
LB: loop body
LE: loop exit
PB: predicated region body
PF: predicated region fallthrough
CT: control target
= control target key end

     0   :  { %10 = vsyncpa [#allocation3], 0  ;;  %s1623_s0 = inlined_call_operand.hbm [shape: f32[2,32,256], index: 0, kind: input, shape index: {}]   ;;  %s1624_s1 = inlined_call_operand.vmem [shape: f32[2,8,32], index: 1, kind: input, shape index: {}]   ;;  %s1625_s2 = inlined_call_operand.vmem [shape: f32[2,32,8], index: 2, kind: input, shape index: {}]   ;;  %s1626_s3 = inlined_call_operand.vmem [shape: f32[2,33,256], index: 3, kind: output, shape index: {0}]   ;;  %s1627_s4 = inlined_call_operand.vmem [shape: f32[2,256,8], index: 4, kind: output, shape index: {1}]  }
   0x1   :  { %12 = vsyncpa [#allocation3 + $0x1], 0  ;;  %s1368_s15 = smov 0   ;;  %s1370_s16 = smov 0  }
   0x2   :  { %s1372_s17 = smov 0   ;;  %s1374_s18 = smov 0  }
   0x3   :  { %s1376_s19 = smov 0   ;;  %s1378_s20 = smov 0  }
   0x4 LB: > { %s1030_s21 = sadd.s32 4294967295, %s1336_s20   ;;  %s30_s22 = sadd.s32 1, %s1332_s19  ;;  %s1336_s20 = sphi %s1378_s20, %s18_s20   ;;  %s1332_s19 = sphi %s1376_s19, %s1635_s19   ;;  %s1328_s18 = sphi %s1374_s18, %s1634_s18   ;;  %s1324_s17 = sphi %s1372_s17, %s1633_s17   ;;  %s1320_s16 = sphi %s1370_s16, %s1632_s16   ;;  %s1316_s15 = sphi %s1368_s15, %s1631_s15  }
   0x5   : > { %p32_p0 = scmp.ge.s32.totalorder %s30_s22, 2  ;;  %s39_s23 = sadd.s32 1, %s1324_s17 }
   0x6   : > { %p46_p1 = scmp.ne.s32.totalorder %s1324_s17, %s1320_s16  ;;  %p47_p2 = scmp.eq.s32.totalorder %s1336_s20, 0 }
   0x7   : > { %s1637_s22 = smov (%p32_p0, %s30_s22), 0  ;;  %p52_p4 = scmp.ne.s32.totalorder %s1320_s16, %s1316_s15 }
   0x8   : > { %p1404_p3 = por %p47_p2, %p46_p1  ;;  %s34_s25 = ssub.s32 %s1332_s19, %s1637_s22 }
   0x9   : > { %p53_p5 = scmp.eq.s32.totalorder %s1030_s21, 0  ;;  %p37_p6 = scmp.eq.s32.totalorder %s34_s25, 0 }
   0xa   : > { %p1203_p8 = scmp.lt.s32.totalorder %s1336_s20, 2  ;;  %s184_s28 = sand.u32 1, %s1324_s17  }
   0xb   : > { %p1411_p7 = por %p53_p5, %p52_p4  ;;  %s1081_s29 = sshll.u32 %s1332_s19, 10 }
   0xc   : > { %s1417_s27 = scalar_select %p37_p6, %s1324_s17, %s39_s23  }
   0xd   : > { %s1034_s30 = sshll.u32 %s184_s28, 6  ;;  %s1424_s7 = scalar_lea.hbm %s1623_s0, %s1081_s29 }
   0xe   : > { %s188_s8 = scalar_lea.vmem [#allocation2], %s1034_s30  ;;  %p1428_p9 = pnand %p1203_p8, %p1404_p3 }
   0xf   : > { %s197_s9 = sshll.u32 %s188_s8, 4  ;;  %s1434_s11 = scalar_lea.sflag [#allocation3], %s184_s28  ;;  %s1432_s9 = int_to_ptr.vmem [resolvable:$true] %s197_s9 }
  0x10   : > { %s1256_s12 = scalar_lea.hbm %s1424_s7, 1024  ;;  %p1258_p11 = pneg %p1428_p9 }
  0x11   : > { %p1257_p10 = scmp.ne.s32.totalorder %s1424_s7, %s1256_s12  ;;  %s1261_s15 = scalar_lea.hbm %s1623_s0, 2048 }
  0x12   : > { %p1262_p0 = scmp.lt.u32.totalorder %s1424_s7, %s1623_s0  ;;  %p1263_p1 = scmp.lt.u32.totalorder %s1261_s15, %s1256_s12 }
  0x13   : > { %p1259_p12 = pnand %p1258_p11, %p1257_p10  ;;  %p1265_p3 = scmp.lt.u32.totalorder %s1256_s12, %s1424_s7 }
  0x14   : > { %p1264_p2 = por %p1263_p1, %p1262_p0 }
  0x15   : > { %p1260_p13 = pneg %p1259_p12 }
  0x16   : > { %p1266_p4 = por %p1265_p3, %p1264_p2 }
  0x18   : > { %p1267_p5 = pnand %p1266_p4, %p1260_p13 }
  0x1a   : > { %1270 = shalt.err (!%p1267_p5)
}
  0x1b   : > { %s1271_s24 = scalar_lea.vmem %s1432_s9, 1024  ;;  %s1338_s25 = smov [#allocation2]  }
  0x1c   : > { %p1272_p6 = scmp.ne.s32.totalorder %s1432_s9, %s1271_s24  ;;  %s1276_s28 = sshll.u32 %s1338_s25, 4  ;;  %s1277_s28 = int_to_ptr.vmem [resolvable:$false] %s1276_s28 }
  0x1d   : > { %s1278_s29 = scalar_lea.vmem %s1277_s28, 2048  ;;  %p1279_p12 = scmp.lt.s32.totalorder %s1432_s9, %s1277_s28 }
  0x1e   : > { %p1274_p8 = pnand %p1272_p6, %p1258_p11  ;;  %p1280_p0 = scmp.lt.s32.totalorder %s1278_s29, %s1271_s24 }
  0x20   : > { %p1275_p10 = pneg %p1274_p8  ;;  %p1281_p1 = por %p1280_p0, %p1279_p12 }
  0x22   : > { %p1282_p2 = pnand %p1281_p1, %p1275_p10 }
  0x24   : > { %1285 = shalt.err (!%p1282_p2)
}
  0x25   : > { %s1339_s30 = smov 256   ;;  %s1340_s5 = smov 16  }
  0x26   : > { %1202 = dma.hbm_to_vmem [thread:$0]  (!%p1428_p9), %s1424_s7, 1024, %s1432_s9, %s1434_s11, %s1339_s30, %s1339_s30, %s1340_s5  }
  0x27   : > { %p1037_p11 = scmp.ge.s32.totalorder %s1336_s20, 1  ;;  %p220_p13 = scmp.lt.s32.totalorder %s1336_s20, 3 }
  0x29   : > { %p221_p3 = pnand %p1037_p11, %p220_p13 }
  0x2a   : > { %s226_s6 = sand.u32 (!%p221_p3), 1, %s1320_s16  }
  0x2b   : > { %224 = sbr.rel (%p221_p3) target bundleno = 480 (0x1e0), region = 32  ;;  %s1038_s8 = sshll.u32 (!%p221_p3), %s226_s6, 6 }
  0x2c   : > { %s227_s12 = scalar_lea.sflag (!%p221_p3), [#allocation3], %s226_s6  ;;  %s230_s13 = scalar_lea.vmem (!%p221_p3), [#allocation2], %s1038_s8 }
  0x32   : > { %1311 = dma.done.wait (%p1411_p7), %s227_s12, 1024  }
  0x33   : > { %1313 = vsyncadd (%p1411_p7), %s227_s12, 4294966272  ;;  %p278_p4 = scmp.lt.s32.totalorder %s1328_s18, 1  ;;  %v308_v0 = vld [vmem:[%s230_s13 + $0x8] sm:$0xff]  ;;  %v307_v1 = vld [vmem:[%s230_s13] sm:$0xff]  ;;  %vm384_vm0 = vcmask 261120   ;;  %v1341_v50 = vmov 0.0  }
  0x34   : > { %v310_v2 = vld [vmem:[%s230_s13 + $0x18] sm:$0xff]  ;;  %352 = vxpose.xlu0.b32.start [1/4] (short) %v308_v0, 128  ;;  %320 = vxpose.xlu1.b32.start [1/4] (short) %v307_v1, 128  ;;  %v309_v3 = vld [vmem:[%s230_s13 + $0x10] sm:$0xff]  ;;  %v312_v4 = vld [vmem:[%s230_s13 + $0x28] sm:$0xff]  ;;  %vm706_vm1 = vcmask 64512  }
  0x35   : > { %s1639_s18 = smov (!%p278_p4, %s1328_s18), 1  ;;  %v311_v5 = vld [vmem:[%s230_s13 + $0x20] sm:$0xff]  ;;  %v1186_v6 = vpack.c.bf16 %v309_v3, %v307_v1  ;;  %v314_v7 = vld [vmem:[%s230_s13 + $0x38] sm:$0xff]  ;;  %v313_v8 = vld [vmem:[%s230_s13 + $0x30] sm:$0xff]  ;;  %v1184_v16 = vpack.c.bf16 %v310_v2, %v308_v0 }
  0x36   : > { %s1196_s7 = smul.u32 80, %s1639_s18  ;;  %s1082_s26 = sshll.u32 %s1639_s18, 5  ;;  %v1190_v9 = vpack.c.bf16 %v313_v8, %v311_v5  ;;  %v1188_v17 = vpack.c.bf16 %v314_v7, %v312_v4 }
  0x37   : > { %s286_s21 = scalar_lea.vmem %s1625_s2, %s1082_s26  ;;  %s1039_s23 = sshll.u32 %s1639_s18, 3 }
  0x38   : > { %s1477_s11 = scalar_lea.vmem %s1626_s3, %s1196_s7  ;;  %v316_v10 = vld [vmem:[%s286_s21] sm:$0xff]  ;;  %v317_v11 = vld [vmem:[%s286_s21 + $0x8] sm:$0xff]  ;;  %353 = vxpose.xlu0.b32.cont [2/4] (short) %v310_v2, 128  ;;  %321 = vxpose.xlu1.b32.cont [2/4] (short) %v309_v3, 128  ;;  %v318_v13 = vld [vmem:[%s286_s21 + $0x10] sm:$0xff]  ;;  %s281_s28 = scalar_lea.vmem %s1624_s1, %s1039_s23 }
  0x39   : > { %829 = vst [vmem:[%s1477_s11 + $0x8] sm:$0xff] %v308_v0  ;;  %828 = vst [vmem:[%s1477_s11] sm:$0xff] %v307_v1  ;;  %v1176_v12 = vpack.c.bf16 %v317_v11, %v316_v10  ;;  %v319_v14 = vld [vmem:[%s286_s21 + $0x18] sm:$0xff]  ;;  %v315_v51 = vld [vmem:[%s281_s28] sm:$0xff]  ;;  %s1083_s29 = sshll.u32 %s1639_s18, 8 }
  0x3a   : > { %831 = vst [vmem:[%s1477_s11 + $0x18] sm:$0xff] %v310_v2  ;;  %830 = vst [vmem:[%s1477_s11 + $0x10] sm:$0xff] %v309_v3  ;;  %v1180_v15 = vpack.c.bf16 %v319_v14, %v318_v13  ;;  %s1538_s6 = scalar_lea.vmem %s1627_s4, %s1083_s29 }
  0x3b   : > { %833 = vst [vmem:[%s1477_s11 + $0x28] sm:$0xff] %v312_v4  ;;  %832 = vst [vmem:[%s1477_s11 + $0x20] sm:$0xff] %v311_v5  ;;  %1192 = vmatprep.subr.bf16.mxu1 %v1176_v12  ;;  %1177 = vmatprep.subr.bf16.mxu0 %v1176_v12 }
  0x3c   : > { %835 = vst [vmem:[%s1477_s11 + $0x38] sm:$0xff] %v314_v7  ;;  %834 = vst [vmem:[%s1477_s11 + $0x30] sm:$0xff] %v313_v8  ;;  %1194 = vmatpush3.bf16.msra.mxu1 %v1176_v12  ;;  %1179 = vmatpush3.bf16.msra.mxu0 %v1176_v12 }
  0x3d   : > { %354 = vxpose.xlu0.b32.cont [3/4] (short) %v312_v4, 128  ;;  %322 = vxpose.xlu1.b32.cont [3/4] (short) %v311_v5, 128 }
  0x3e   : > { %1193 = vmatprep.subr.bf16.mxu1 %v1180_v15  ;;  %1181 = vmatprep.subr.bf16.mxu0 %v1180_v15 }
  0x40   : > { %1195 = vmatpush3.bf16.msra.mxu1 %v1180_v15  ;;  %1183 = vmatpush3.bf16.msra.mxu0 %v1180_v15 }
  0x41   : > { %355 = vxpose.xlu0.b32.end [4/4] (short) %v314_v7, 128  ;;  %323 = vxpose.xlu1.b32.end [4/4] (short) %v313_v8, 128 }
  0x42   : > { %1185 = vmatprep.subr.bf16.mxu1 %v1184_v16 }
  0xb5   : > { %v1491_v18 = vpop.trf.xlu0  ;;  %v336_v19 = vpop.trf.xlu1 }
  0xb6   : > { %1128 = vmatprep.mubr.msk.f32.mxu0 %vm384_vm0, %v336_v19 }
  0xb9   : > { %v1494_v20 = vpop.trf.xlu0  ;;  %v337_v21 = vpop.trf.xlu1 }
  0xba   : > { %1129 = vmatmul.mubr.msk.f32.vlgmr.msra.gmra.mrb[0].mxu0 %vm384_vm0, %v337_v21 }
  0xbd   : > { %v370_v22 = vpop.trf.xlu0  ;;  %v338_v23 = vpop.trf.xlu1 }
  0xbe   : > { %1155 = vmatprep.mubr.msk.f32.mxu1 %vm384_vm0, %v370_v22  ;;  %1131 = vmatprep.mubr.msk.f32.mxu0 %vm384_vm0, %v338_v23 }
  0xc1   : > { %v371_v24 = vpop.trf.xlu0  ;;  %v339_v25 = vpop.trf.xlu1 }
  0xc2   : > { %1156 = vmatmul.mubr.msk.f32.vlgmr.msra.gmra.mrb[0].mxu1 %vm384_vm0, %v371_v24  ;;  %1132 = vmatmul.mubr.msk.f32.gmra.mrb[2].mxu0 %vm384_vm0, %v339_v25 }
  0xc3   : > { %1187 = vmatpush1.bf16.msra.mxu1 %v1186_v6 }
  0xc4   : > { %1189 = vmatprep.subr.bf16.mxu1 %v1188_v17 }
  0xc5   : > { %v372_v26 = vpop.trf.xlu0  ;;  %v340_v27 = vpop.trf.xlu1 }
  0xc6   : > { %1158 = vmatprep.mubr.msk.f32.mxu1 %vm384_vm0, %v372_v26  ;;  %1134 = vmatprep.mubr.msk.f32.mxu0 %vm384_vm0, %v340_v27 }
  0xc7   : > { %1191 = vmatpush1.bf16.msra.mxu1 %v1190_v9 }
  0xc9   : > { %v373_v28 = vpop.trf.xlu0  ;;  %v341_v29 = vpop.trf.xlu1 }
  0xca   : > { %1159 = vmatmul.mubr.msk.f32.gmra.mrb[2].mxu1 %vm384_vm0, %v373_v28  ;;  %1135 = vmatmul.mubr.msk.f32.gmra.mrb[4].mxu0 %vm384_vm0, %v341_v29  ;;  %v1342_v28 = vmov 1966171168  }
  0xcb   : > { %v840_v29 = vunpack.c.l.s4 %v1342_v28 }
  0xcd   : > { %v374_v30 = vpop.trf.xlu0  ;;  %v342_v31 = vpop.trf.xlu1 }
  0xce   : > { %1161 = vmatprep.mubr.msk.f32.mxu1 %vm384_vm0, %v374_v30  ;;  %1137 = vmatprep.mubr.msk.f32.mxu0 %vm384_vm0, %v342_v31  ;;  %v842_v30 = vlaneseq }
  0xd0   : > { %vm856_vm2 = vcmp.lt.s32.totalorder %v842_v30, 256 }
  0xd1   : > { %v375_v32 = vpop.trf.xlu0  ;;  %v343_v33 = vpop.trf.xlu1 }
  0xd2   : > { %1162 = vmatmul.mubr.msk.f32.gmra.mrb[4].mxu1 %vm384_vm0, %v375_v32  ;;  %1138 = vmatmul.mubr.msk.f32.gmra.mrb[6].mxu0 %vm384_vm0, %v343_v33 }
  0xd5   : > { %v376_v34 = vpop.trf.xlu0  ;;  %v344_v35 = vpop.trf.xlu1 }
  0xd6   : > { %1164 = vmatprep.mubr.msk.f32.mxu1 %vm384_vm0, %v376_v34  ;;  %1140 = vmatprep.mubr.msk.f32.mxu0 %vm384_vm0, %v344_v35  ;;  %v841_v35 = vunpack.c.0.s8 %v840_v29 }
  0xd9   : > { %v377_v36 = vpop.trf.xlu0  ;;  %v345_v37 = vpop.trf.xlu1 }
  0xda   : > { %1165 = vmatmul.mubr.msk.f32.gmra.mrb[6].mxu1 %vm384_vm0, %v377_v36  ;;  %1141 = vmatmul.mubr.msk.f32.gmra.mrb[8].mxu0 %vm384_vm0, %v345_v37  ;;  %v843_v36 = vshrl.u32 %v842_v30, 7 }
  0xdd   : > { %v378_v38 = vpop.trf.xlu0  ;;  %v346_v39 = vpop.trf.xlu1 }
  0xde   : > { %1167 = vmatprep.mubr.msk.f32.mxu1 %vm384_vm0, %v378_v38  ;;  %1143 = vmatprep.mubr.msk.f32.mxu0 %vm384_vm0, %v346_v39 }
  0xe1   : > { %v379_v40 = vpop.trf.xlu0  ;;  %v347_v41 = vpop.trf.xlu1 }
  0xe2   : > { %1168 = vmatmul.mubr.msk.f32.gmra.mrb[8].mxu1 %vm384_vm0, %v379_v40  ;;  %1144 = vmatmul.mubr.msk.f32.gmra.mrb[10].mxu0 %vm384_vm0, %v347_v41  ;;  %v844_v41 = vsub.s32 %v841_v35, %v843_v36 }
  0xe5   : > { %v380_v42 = vpop.trf.xlu0  ;;  %v348_v43 = vpop.trf.xlu1 }
  0xe6   : > { %1170 = vmatprep.mubr.msk.f32.mxu1 %vm384_vm0, %v380_v42  ;;  %1146 = vmatprep.mubr.msk.f32.mxu0 %vm384_vm0, %v348_v43 }
  0xe9   : > { %v381_v44 = vpop.trf.xlu0  ;;  %v349_v45 = vpop.trf.xlu1 }
  0xea   : > { %1171 = vmatmul.mubr.msk.f32.gmra.mrb[10].mxu1 %vm384_vm0, %v381_v44  ;;  %1147 = vmatmul.mubr.msk.f32.gmra.mrb[12].mxu0 %vm384_vm0, %v349_v45 }
  0xed   : > { %v382_v46 = vpop.trf.xlu0  ;;  %v350_v47 = vpop.trf.xlu1 }
  0xee   : > { %1173 = vmatprep.mubr.msk.f32.mxu1 %vm384_vm0, %v382_v46  ;;  %1149 = vmatprep.mubr.msk.f32.mxu0 %vm384_vm0, %v350_v47 }
  0xf1   : > { %v383_v48 = vpop.trf.xlu0  ;;  %v351_v49 = vpop.trf.xlu1 }
  0xf2   : > { %1150 = vmatmul.mubr.msk.f32.gmra.mrb[14].mxu0 %vm384_vm0, %v351_v49  ;;  %1174 = vmatmul.mubr.msk.f32.gmra.mrb[12].mxu1 %vm384_vm0, %v383_v48 }
  0xf3   : > { %1152 = vmatprep.mubr.msk.f32.mxu0 %vm384_vm0, %v1491_v18  ;;  %806 = vmatprep.mubr.f32.mxu1 %v1341_v50 }
  0xf6   : > { %1153 = vmatmul.mubr.msk.f32.gmra.mrb[16].mxu0 %vm384_vm0, %v1494_v20  ;;  %1077 = vmatmul.mubr.msk.f32.vlgmr.msra.gmra.mrb[14].mxu1 %vm384_vm0, %v315_v51 }
 0x18d   : > { %v1130_v52 = vpop.f32.mrb[0].mxu0 }
 0x18e   : > { %708 = vst.msk [vmem:[%s1538_s6 + $0x8] sm:$0xff] %vm706_vm1, %v1130_v52  ;;  %v547_v53 = vpop.f32.mrb[1].mxu0 }
 0x18f   : > { %707 = vst.msk [vmem:[%s1538_s6] sm:$0xff] %vm706_vm1, %v547_v53 }
 0x195   : > { %v1157_v54 = vpop.f32.mrb[0].mxu1  ;;  %v1133_v55 = vpop.f32.mrb[2].mxu0 }
 0x196   : > { %726 = vst.msk [vmem:[%s1538_s6 + $0x98] sm:$0xff] %vm706_vm1, %v1157_v54  ;;  %v637_v56 = vpop.f32.mrb[1].mxu1  ;;  %710 = vst.msk [vmem:[%s1538_s6 + $0x18] sm:$0xff] %vm706_vm1, %v1133_v55  ;;  %v557_v57 = vpop.f32.mrb[3].mxu0 }
 0x197   : > { %725 = vst.msk [vmem:[%s1538_s6 + $0x90] sm:$0xff] %vm706_vm1, %v637_v56  ;;  %709 = vst.msk [vmem:[%s1538_s6 + $0x10] sm:$0xff] %vm706_vm1, %v557_v57 }
 0x19d   : > { %v1160_v58 = vpop.f32.mrb[2].mxu1  ;;  %v1136_v59 = vpop.f32.mrb[4].mxu0 }
 0x19e   : > { %728 = vst.msk [vmem:[%s1538_s6 + $0xa8] sm:$0xff] %vm706_vm1, %v1160_v58  ;;  %v647_v60 = vpop.f32.mrb[3].mxu1  ;;  %712 = vst.msk [vmem:[%s1538_s6 + $0x28] sm:$0xff] %vm706_vm1, %v1136_v59  ;;  %v567_v61 = vpop.f32.mrb[5].mxu0 }
 0x19f   : > { %727 = vst.msk [vmem:[%s1538_s6 + $0xa0] sm:$0xff] %vm706_vm1, %v647_v60  ;;  %711 = vst.msk [vmem:[%s1538_s6 + $0x20] sm:$0xff] %vm706_vm1, %v567_v61 }
 0x1a5   : > { %v1163_v62 = vpop.f32.mrb[4].mxu1  ;;  %v1139_v63 = vpop.f32.mrb[6].mxu0 }
 0x1a6   : > { %730 = vst.msk [vmem:[%s1538_s6 + $0xb8] sm:$0xff] %vm706_vm1, %v1163_v62  ;;  %v657_v0 = vpop.f32.mrb[5].mxu1  ;;  %714 = vst.msk [vmem:[%s1538_s6 + $0x38] sm:$0xff] %vm706_vm1, %v1139_v63  ;;  %v577_v1 = vpop.f32.mrb[7].mxu0 }
 0x1a7   : > { %729 = vst.msk [vmem:[%s1538_s6 + $0xb0] sm:$0xff] %vm706_vm1, %v657_v0  ;;  %713 = vst.msk [vmem:[%s1538_s6 + $0x30] sm:$0xff] %vm706_vm1, %v577_v1 }
 0x1ad   : > { %v1166_v2 = vpop.f32.mrb[6].mxu1  ;;  %v1142_v3 = vpop.f32.mrb[8].mxu0 }
 0x1ae   : > { %732 = vst.msk [vmem:[%s1538_s6 + $0xc8] sm:$0xff] %vm706_vm1, %v1166_v2  ;;  %v667_v4 = vpop.f32.mrb[7].mxu1  ;;  %716 = vst.msk [vmem:[%s1538_s6 + $0x48] sm:$0xff] %vm706_vm1, %v1142_v3  ;;  %v587_v5 = vpop.f32.mrb[9].mxu0 }
 0x1af   : > { %731 = vst.msk [vmem:[%s1538_s6 + $0xc0] sm:$0xff] %vm706_vm1, %v667_v4  ;;  %715 = vst.msk [vmem:[%s1538_s6 + $0x40] sm:$0xff] %vm706_vm1, %v587_v5 }
 0x1b5   : > { %v1169_v6 = vpop.f32.mrb[8].mxu1  ;;  %v1145_v7 = vpop.f32.mrb[10].mxu0 }
 0x1b6   : > { %734 = vst.msk [vmem:[%s1538_s6 + $0xd8] sm:$0xff] %vm706_vm1, %v1169_v6  ;;  %v677_v8 = vpop.f32.mrb[9].mxu1  ;;  %718 = vst.msk [vmem:[%s1538_s6 + $0x58] sm:$0xff] %vm706_vm1, %v1145_v7  ;;  %v597_v9 = vpop.f32.mrb[11].mxu0 }
 0x1b7   : > { %733 = vst.msk [vmem:[%s1538_s6 + $0xd0] sm:$0xff] %vm706_vm1, %v677_v8  ;;  %717 = vst.msk [vmem:[%s1538_s6 + $0x50] sm:$0xff] %vm706_vm1, %v597_v9 }
 0x1bd   : > { %v1172_v10 = vpop.f32.mrb[10].mxu1  ;;  %v1148_v11 = vpop.f32.mrb[12].mxu0 }
 0x1be   : > { %736 = vst.msk [vmem:[%s1538_s6 + $0xe8] sm:$0xff] %vm706_vm1, %v1172_v10  ;;  %v687_v12 = vpop.f32.mrb[11].mxu1  ;;  %720 = vst.msk [vmem:[%s1538_s6 + $0x68] sm:$0xff] %vm706_vm1, %v1148_v11  ;;  %v607_v13 = vpop.f32.mrb[13].mxu0 }
 0x1bf   : > { %735 = vst.msk [vmem:[%s1538_s6 + $0xe0] sm:$0xff] %vm706_vm1, %v687_v12  ;;  %719 = vst.msk [vmem:[%s1538_s6 + $0x60] sm:$0xff] %vm706_vm1, %v607_v13 }
 0x1c5   : > { %v1175_v14 = vpop.f32.mrb[12].mxu1  ;;  %v1151_v15 = vpop.f32.mrb[14].mxu0 }
 0x1c6   : > { %738 = vst.msk [vmem:[%s1538_s6 + $0xf8] sm:$0xff] %vm706_vm1, %v1175_v14  ;;  %v697_v16 = vpop.f32.mrb[13].mxu1  ;;  %722 = vst.msk [vmem:[%s1538_s6 + $0x78] sm:$0xff] %vm706_vm1, %v1151_v15  ;;  %v617_v17 = vpop.f32.mrb[15].mxu0 }
 0x1c7   : > { %737 = vst.msk [vmem:[%s1538_s6 + $0xf0] sm:$0xff] %vm706_vm1, %v697_v16  ;;  %721 = vst.msk [vmem:[%s1538_s6 + $0x70] sm:$0xff] %vm706_vm1, %v617_v17 }
 0x1c9   : > { %v1154_v18 = vpop.f32.mrb[16].mxu0  ;;  %v808_v19 = vpop.f32.mrb[14].mxu1 }
 0x1ca   : > { %724 = vst.msk [vmem:[%s1538_s6 + $0x88] sm:$0xff] %vm706_vm1, %v1154_v18  ;;  %v813_v20 = vrot.slane %v808_v19, 4  ;;  %v627_v21 = vpop.f32.mrb[17].mxu0  ;;  %v810_v22 = vpop.f32.mrb[15].mxu1 }
 0x1cb   : > { %723 = vst.msk [vmem:[%s1538_s6 + $0x80] sm:$0xff] %vm706_vm1, %v627_v21  ;;  %v819_v23 = vrot.slane %v810_v22, 4 }
 0x1cc   : > { %v814_v24 = vadd.f32 %v813_v20, %v808_v19 }
 0x1cd   : > { %v820_v25 = vadd.f32 %v819_v23, %v810_v22 }
 0x1ce   : > { %v815_v26 = vrot.slane %v814_v24, 2 }
 0x1cf   : > { %v821_v27 = vrot.slane %v820_v25, 2 }
 0x1d0   : > { %v816_v31 = vadd.f32 %v815_v26, %v814_v24 }
 0x1d1   : > { %v822_v32 = vadd.f32 %v821_v27, %v820_v25 }
 0x1d2   : > { %v817_v33 = vrot.slane %v816_v31, 1 }
 0x1d3   : > { %v823_v34 = vrot.slane %v822_v32, 1 }
 0x1d4   : > { %v818_v37 = vadd.f32 %v817_v33, %v816_v31 }
 0x1d5   : > { %v824_v38 = vadd.f32 %v823_v34, %v822_v32 }
 0x1d6   : > { %v826_v39 = vmul.f32 0.125, %v818_v37 }
 0x1d7   : > { %v827_v40 = vmul.f32 0.125, %v824_v38 }
 0x1d9   : > { %v838_v42 = vcombine.low %v826_v39, %v827_v40 }
 0x1db   : > { %v845_v43 = vrot.slane %v838_v42, %v844_v41 }
 0x1dd   : > { %v852_v44 = vrot.slane %v845_v43, %v844_v41 }
 0x1df   : > { %1078 = vst.msk [vmem:[%s1477_s11 + $0x40] ss:$8 sm:$0x3] %vm856_vm2, %v852_v44 }
 0x1e0 PF: > { %s18_s20 = sadd.s32 1, %s1336_s20   ;;  %s1631_s15 = smov %s1320_s16 }
 0x1e1   : > { %p15_p7 = scmp.ge.s32.totalorder %s18_s20, 4   ;;  %s1632_s16 = smov %s1324_s17 }
 0x1e2   : > { %s1633_s17 = smov %s1417_s27  ;;  %s1634_s18 = smov %s1332_s19 }
 0x1e3   : > { %s1635_s19 = smov %s1637_s22  ;;  %17 = sbr.rel (!%p15_p7) target bundleno = 4 (0x4), region = 91 }
 0x1ea   :  { %916 = vsyncpa [#allocation3], 1 }
 0x1eb   :  { %918 = vsyncpa [#allocation3 + $0x1], 1 }

</bundles_post_ra>
